<compile_context>
chip_gen: v7x
topology: tpu7x:2x2x1
jax: 0.10.0
libtpu: 0.0.40
codegen_flags: <defaults>
</compile_context>

<pallas_src>
import functools

import jax
import jax.numpy as jnp
from jax.experimental import pallas as pl
from jax.experimental.pallas import tpu as pltpu


# ---------------------------------------------------------------------------
# Pallas kernel: one SAGEConv layer (K-tiled aggregation + fused linears)
# ---------------------------------------------------------------------------
def _sage_conv_kernel(a_ref, xn_ref, xr_ref, inv_deg_ref, w_ref, b_ref,
                      o_ref, acc_ref, *, apply_relu):
    # a_ref:       (TN, TK)          int8  unnormalized adjacency counts (rows i, cols k)
    # xn_ref:      (TK, Fp_in)       bf16  neighbor features for this K tile
    # xr_ref:      (TN, Fp_in)       bf16  root features for this node tile (constant over k)
    # inv_deg_ref: (TN, 1)           f32   1 / max(deg, 1)
    # w_ref:       (2*Fp_in, Fp_out) bf16  stacked [W_l; W_r] (zero-padded)
    # b_ref:       (1, Fp_out)       f32   bias (zero-padded)
    # o_ref:       (TN, Fp_out)      bf16/f32 output tile
    # acc_ref:     (TN, Fp_in)       f32   aggregation accumulator (scratch)
    k = pl.program_id(1)

    @pl.when(k == 0)
    def _():
        acc_ref[...] = jnp.zeros_like(acc_ref)

    # int8 -> bf16 upcast rides the VPU (hidden behind the dominant A DMA).
    a = a_ref[...].astype(jnp.bfloat16)
    acc_ref[...] += jnp.dot(a, xn_ref[...], preferred_element_type=jnp.float32)

    @pl.when(k == pl.num_programs(1) - 1)
    def _():
        fp_in = acc_ref.shape[1]
        # f32 mean normalization (exact degrees, no bf16 1/deg rounding).
        agg = (acc_ref[...] * inv_deg_ref[...]).astype(jnp.bfloat16)
        # Concat-free fused linears: static ref slices instead of a materialized concat.
        h = jnp.dot(agg, w_ref[:fp_in, :], preferred_element_type=jnp.float32)
        h = h + jnp.dot(xr_ref[...], w_ref[fp_in:, :],
                        preferred_element_type=jnp.float32)
        h = h + b_ref[...]
        if apply_relu:
            h = jnp.maximum(h, 0.0)
        o_ref[...] = h.astype(o_ref.dtype)


def _vmem_limit_bytes(tile_n, tile_k, fp_in, fp_out, out_bytes):
    # Double-buffered inputs/outputs + single-buffered accumulator, with headroom.
    a = tile_n * tile_k * 1
    xn = tile_k * fp_in * 2
    xr = tile_n * fp_in * 2
    inv = tile_n * 4
    w = 2 * fp_in * fp_out * 2
    b = fp_out * 4
    out = tile_n * fp_out * out_bytes
    acc = tile_n * fp_in * 4
    est = 2 * (a + xn + xr + inv + w + b + out) + acc
    return int(min(max(2 * est + (4 << 20), 24 << 20), 48 << 20))


def sage_conv(x_p, a_counts, inv_deg, w_stacked, b_p, *, apply_relu, out_dtype,
              tile_n, tile_k):
    """One SAGEConv layer on padded operands (x bf16, A int8 counts)."""
    n, fp_in = x_p.shape
    fp_out = w_stacked.shape[1]
    assert n % tile_n == 0 and n % tile_k == 0

    kernel = functools.partial(_sage_conv_kernel, apply_relu=apply_relu)
    out_bytes = jnp.dtype(out_dtype).itemsize
    return pl.pallas_call(
        kernel,
        out_shape=jax.ShapeDtypeStruct((n, fp_out), out_dtype),
        grid_spec=pltpu.PrefetchScalarGridSpec(
            num_scalar_prefetch=0,
            grid=(n // tile_n, n // tile_k),
            in_specs=[
                pl.BlockSpec((tile_n, tile_k), lambda i, k: (i, k)),     # A counts tile
                pl.BlockSpec((tile_k, fp_in), lambda i, k: (k, 0)),      # neighbor X
                pl.BlockSpec((tile_n, fp_in), lambda i, k: (i, 0)),      # root X
                pl.BlockSpec((tile_n, 1), lambda i, k: (i, 0)),          # inv_deg
                pl.BlockSpec((2 * fp_in, fp_out), lambda i, k: (0, 0)),  # [W_l; W_r]
                pl.BlockSpec((1, fp_out), lambda i, k: (0, 0)),          # bias
            ],
            out_specs=pl.BlockSpec((tile_n, fp_out), lambda i, k: (i, 0)),
            scratch_shapes=[pltpu.VMEM((tile_n, fp_in), jnp.float32)],
        ),
        compiler_params=pltpu.CompilerParams(
            dimension_semantics=("parallel", "arbitrary"),
            vmem_limit_bytes=_vmem_limit_bytes(tile_n, tile_k, fp_in, fp_out,
                                               out_bytes)),
    )(a_counts, x_p, x_p, inv_deg, w_stacked, b_p)


# ---------------------------------------------------------------------------
# Wrapper / glue
# ---------------------------------------------------------------------------
def _round_up(v, m):
    return (v + m - 1) // m * m


def _pick_tile_n(n_pad):
    # 256 rows match the v6e/v7x 256-wide MXU and cut neighbor-feature re-reads;
    # cap at n_pad // 2 so v7x's two TensorCores always both get node tiles.
    assert n_pad % 256 == 0
    return 256 if n_pad >= 512 else n_pad // 2


def _pick_tile_k(n_pad):
    # Big K tiles amortize the ~0.35us per-grid-step pipeline overhead (HBM-bound kernel).
    for t in (4096, 2048, 1024, 512, 256):
        if n_pad % t == 0:
            return t
    return 256  # unreachable: n_pad is a multiple of 256


def build_mean_aggregation(edge_index, num_nodes):
    """Unnormalized int8 edge counts + f32 inverse degrees (built once per graph)."""
    src, dst = edge_index[0], edge_index[1]
    counts = jnp.zeros((num_nodes, num_nodes), jnp.int32).at[dst, src].add(1)
    deg = jnp.sum(counts, axis=1, keepdims=True).astype(jnp.float32)
    inv_deg = 1.0 / jnp.maximum(deg, 1.0)
    # Counts are tiny in practice; int8 halves the dominant HBM stream exactly.
    return counts.astype(jnp.int8), inv_deg


def sage_forward(x, a_counts, inv_deg, params):
    """Equivalent of SAGE.forward in inference mode (dropout = identity)."""
    n, f_in = x.shape
    n_pad = _round_up(max(n, 256), 256)
    tile_n = _pick_tile_n(n_pad)
    tile_k = _pick_tile_k(n_pad)
    num_layers = len(params)

    # Pad the graph operators and features (identity-preserving: zero rows/cols).
    a_p = jnp.zeros((n_pad, n_pad), jnp.int8).at[:n, :n].set(a_counts)
    inv_p = jnp.ones((n_pad, 1), jnp.float32).at[:n, :].set(inv_deg)

    fp_in0 = _round_up(f_in, 128)
    h = jnp.zeros((n_pad, fp_in0), jnp.bfloat16).at[:n, :f_in].set(
        x.astype(jnp.bfloat16))

    for li, (w_l, w_r, b) in enumerate(params):
        last = li == num_layers - 1
        f_in_l, f_out_l = w_l.shape
        fp_in_l = _round_up(f_in_l, 128)
        fp_out_l = _round_up(f_out_l, 128)
        assert h.shape[1] == fp_in_l

        w_stacked = jnp.zeros((2 * fp_in_l, fp_out_l), jnp.float32)
        w_stacked = w_stacked.at[:f_in_l, :f_out_l].set(w_l)
        w_stacked = w_stacked.at[fp_in_l:fp_in_l + f_in_l, :f_out_l].set(w_r)
        w_stacked = w_stacked.astype(jnp.bfloat16)
        b_p = jnp.zeros((1, fp_out_l), jnp.float32).at[:, :f_out_l].set(b)

        out_dtype = jnp.float32 if last else jnp.bfloat16
        h = sage_conv(h, a_p, inv_p, w_stacked, b_p,
                      apply_relu=not last, out_dtype=out_dtype,
                      tile_n=tile_n, tile_k=tile_k)
        # F.dropout(p=0.5, training=False) -> identity in inference.

    f_out_final = params[-1][0].shape[1]
    return h[:n, :f_out_final]


def init_sage_params(key, in_channels, hidden_channels, out_channels):
    dims = [(in_channels, hidden_channels), (hidden_channels, out_channels)]
    params = []
    for (f_in, f_out) in dims:
        key, k1, k2 = jax.random.split(key, 3)
        scale = 1.0 / jnp.sqrt(jnp.float32(f_in))
        w_l = jax.random.uniform(k1, (f_in, f_out), jnp.float32, -scale, scale)
        w_r = jax.random.uniform(k2, (f_in, f_out), jnp.float32, -scale, scale)
        b = jnp.zeros((1, f_out), jnp.float32)
        params.append((w_l, w_r, b))
    return params


def sage_reference(x, a_counts, inv_deg, params):
    """Plain-JAX reference mirroring the kernel's bf16-input / f32-accumulate numerics."""
    bf16 = jnp.bfloat16
    a = a_counts.astype(bf16)
    h = x
    for i, (w_l, w_r, b) in enumerate(params):
        hb = h.astype(bf16)
        agg = jnp.dot(a, hb, preferred_element_type=jnp.float32) * inv_deg
        out = (jnp.dot(agg.astype(bf16), w_l.astype(bf16),
                       preferred_element_type=jnp.float32)
               + jnp.dot(hb, w_r.astype(bf16),
                         preferred_element_type=jnp.float32)
               + b)
        if i < len(params) - 1:
            out = jnp.maximum(out, 0.0).astype(bf16)  # layer-1 activations stored bf16
        h = out
    return h.astype(jnp.float32)


if __name__ == "__main__":
    N, E = 128, 512
    IN_CH, HID_CH, OUT_CH = 32, 32, 16

    key = jax.random.PRNGKey(0)
    k_x, k_src, k_dst, k_p = jax.random.split(key, 4)

    x = jax.random.normal(k_x, (N, IN_CH), jnp.float32)
    src = jax.random.randint(k_src, (E,), 0, N, jnp.int32)
    dst = jax.random.randint(k_dst, (E,), 0, N, jnp.int32)
    edge_index = jnp.stack([src, dst], axis=0)  # (2, E): row 0 = source, row 1 = target

    params = init_sage_params(k_p, IN_CH, HID_CH, OUT_CH)

    # Adjacency/degrees are a property of the graph: build them once, outside the forward.
    a_counts, inv_deg = build_mean_aggregation(edge_index, N)

    fwd = jax.jit(sage_forward)
    out = fwd(x, a_counts, inv_deg, params)
    jax.block_until_ready(out)
    assert out.shape == (N, OUT_CH)

    ref = sage_reference(x, a_counts, inv_deg, params)
    max_err = float(jnp.max(jnp.abs(out - ref)))
    assert jnp.allclose(out, ref, atol=5e-3, rtol=5e-3), max_err

    print("KERNEL_OK")
</pallas_src>

<mosaic_0001>
module attributes {stable_mosaic.version = 11 : i64} {
  func.func @_sage_conv_kernel(%arg0: i32, %arg1: i32, %arg2: memref<128x256xi8, #tpu.memory_space<vmem>>, %arg3: memref<256x128xbf16, #tpu.memory_space<vmem>>, %arg4: memref<128x128xbf16, #tpu.memory_space<vmem>>, %arg5: memref<128x1xf32, #tpu.memory_space<vmem>>, %arg6: memref<256x128xbf16, #tpu.memory_space<vmem>>, %arg7: memref<1x128xf32, #tpu.memory_space<vmem>>, %arg8: memref<128x128xbf16, #tpu.memory_space<vmem>>, %arg9: memref<128x128xf32, #tpu.memory_space<vmem>>) attributes {dimension_semantics = [#tpu.dimension_semantics<parallel>, #tpu.dimension_semantics<arbitrary>], iteration_bounds = array<i64: 2, 1>, scalar_prefetch = 0 : i64, scratch_operands = 1 : i64, tpu.core_type = #tpu.core_type<tc>, window_params = [{transform_indices = @transform_0, window_bounds = array<i64: 128, 256>}, {transform_indices = @transform_1, window_bounds = array<i64: 256, 128>}, {transform_indices = @transform_2, window_bounds = array<i64: 128, 128>}, {transform_indices = @transform_3, window_bounds = array<i64: 128, 1>}, {pipeline_mode = #tpu.pipeline_mode<synchronous>, transform_indices = @transform_4, window_bounds = array<i64: 256, 128>}, {pipeline_mode = #tpu.pipeline_mode<synchronous>, transform_indices = @transform_5, window_bounds = array<i64: 1, 128>}, {transform_indices = @transform_6, window_bounds = array<i64: 128, 128>}]} {
    %c0_i32 = arith.constant 0 : i32
    %0 = arith.cmpi eq, %arg1, %c0_i32 : i32
    %1 = arith.extui %0 : i1 to i32
    %c0_i32_0 = arith.constant 0 : i32
    %2 = arith.cmpi ne, %1, %c0_i32_0 : i32
    scf.if %2 {
      %cst_10 = arith.constant 0.000000e+00 : f32
      %13 = vector.broadcast %cst_10 : f32 to vector<128x128xf32>
      %c0_11 = arith.constant 0 : index
      %c0_12 = arith.constant 0 : index
      %14 = vector.load %arg9[%c0_11, %c0_12] : memref<128x128xf32, #tpu.memory_space<vmem>>, vector<128x128xf32>
      tpu.vector_store %arg9[%c0_11, %c0_12], %13 {strides = array<i32>} : memref<128x128xf32, #tpu.memory_space<vmem>>, vector<128x128xf32>,
    } else {
    }
    %c0 = arith.constant 0 : index
    %c0_1 = arith.constant 0 : index
    %3 = vector.load %arg2[%c0, %c0_1] : memref<128x256xi8, #tpu.memory_space<vmem>>, vector<128x256xi8>
    %4 = arith.sitofp %3 : vector<128x256xi8> to vector<128x256xbf16>
    %c0_2 = arith.constant 0 : index
    %c0_3 = arith.constant 0 : index
    %5 = vector.load %arg9[%c0_2, %c0_3] : memref<128x128xf32, #tpu.memory_space<vmem>>, vector<128x128xf32>
    %c0_4 = arith.constant 0 : index
    %c0_5 = arith.constant 0 : index
    %6 = vector.load %arg3[%c0_4, %c0_5] : memref<256x128xbf16, #tpu.memory_space<vmem>>, vector<256x128xbf16>
    %cst = arith.constant dense<0.000000e+00> : vector<128x128xf32>
    %7 = tpu.matmul %4, %6, %cst {dimension_numbers = #tpu.dot_dimension_numbers<[1], [0], [0], [1], [0, 0, 1, 1], [], []>} : vector<128x256xbf16>, vector<256x128xbf16>, vector<128x128xf32> -> vector<128x128xf32>
    %8 = arith.addf %5, %7 : vector<128x128xf32>
    %c0_6 = arith.constant 0 : index
    %c0_7 = arith.constant 0 : index
    %9 = vector.load %arg9[%c0_6, %c0_7] : memref<128x128xf32, #tpu.memory_space<vmem>>, vector<128x128xf32>
    tpu.vector_store %arg9[%c0_6, %c0_7], %8 {strides = array<i32>} : memref<128x128xf32, #tpu.memory_space<vmem>>, vector<128x128xf32>,
    %c0_i32_8 = arith.constant 0 : i32
    %10 = arith.cmpi eq, %arg1, %c0_i32_8 : i32
    %11 = arith.extui %10 : i1 to i32
    %c0_i32_9 = arith.constant 0 : i32
    %12 = arith.cmpi ne, %11, %c0_i32_9 : i32
    scf.if %12 {
      %c0_10 = arith.constant 0 : index
      %c0_11 = arith.constant 0 : index
      %13 = vector.load %arg9[%c0_10, %c0_11] : memref<128x128xf32, #tpu.memory_space<vmem>>, vector<128x128xf32>
      %c0_12 = arith.constant 0 : index
      %c0_13 = arith.constant 0 : index
      %14 = vector.load %arg5[%c0_12, %c0_13] : memref<128x1xf32, #tpu.memory_space<vmem>>, vector<128x1xf32>
      %15 = vector.broadcast %14 : vector<128x1xf32> to vector<128x128xf32>
      %16 = arith.mulf %13, %15 : vector<128x128xf32>
      %17 = arith.truncf %16 : vector<128x128xf32> to vector<128x128xbf16>
      %c0_14 = arith.constant 0 : index
      %c0_15 = arith.constant 0 : index
      %18 = vector.load %arg6[%c0_14, %c0_15] : memref<256x128xbf16, #tpu.memory_space<vmem>>, vector<128x128xbf16>
      %cst_16 = arith.constant dense<0.000000e+00> : vector<128x128xf32>
      %19 = tpu.matmul %17, %18, %cst_16 {dimension_numbers = #tpu.dot_dimension_numbers<[1], [0], [0], [1], [0, 0, 1, 1], [], []>} : vector<128x128xbf16>, vector<128x128xbf16>, vector<128x128xf32> -> vector<128x128xf32>
      %c0_17 = arith.constant 0 : index
      %c0_18 = arith.constant 0 : index
      %20 = vector.load %arg4[%c0_17, %c0_18] : memref<128x128xbf16, #tpu.memory_space<vmem>>, vector<128x128xbf16>
      %c128 = arith.constant 128 : index
      %c0_19 = arith.constant 0 : index
      %21 = vector.load %arg6[%c128, %c0_19] : memref<256x128xbf16, #tpu.memory_space<vmem>>, vector<128x128xbf16>
      %cst_20 = arith.constant dense<0.000000e+00> : vector<128x128xf32>
      %22 = tpu.matmul %20, %21, %cst_20 {dimension_numbers = #tpu.dot_dimension_numbers<[1], [0], [0], [1], [0, 0, 1, 1], [], []>} : vector<128x128xbf16>, vector<128x128xbf16>, vector<128x128xf32> -> vector<128x128xf32>
      %23 = arith.addf %19, %22 : vector<128x128xf32>
      %c0_21 = arith.constant 0 : index
      %c0_22 = arith.constant 0 : index
      %24 = vector.load %arg7[%c0_21, %c0_22] : memref<1x128xf32, #tpu.memory_space<vmem>>, vector<1x128xf32>
      %25 = vector.broadcast %24 : vector<1x128xf32> to vector<128x128xf32>
      %26 = arith.addf %23, %25 : vector<128x128xf32>
      %cst_23 = arith.constant 0.000000e+00 : f32
      %27 = vector.broadcast %cst_23 : f32 to vector<128x128xf32>
      %28 = arith.maximumf %26, %27 : vector<128x128xf32>
      %29 = arith.truncf %28 : vector<128x128xf32> to vector<128x128xbf16>
      %c0_24 = arith.constant 0 : index
      %c0_25 = arith.constant 0 : index
      %30 = vector.load %arg8[%c0_24, %c0_25] : memref<128x128xbf16, #tpu.memory_space<vmem>>, vector<128x128xbf16>
      tpu.vector_store %arg8[%c0_24, %c0_25], %29 {strides = array<i32>} : memref<128x128xbf16, #tpu.memory_space<vmem>>, vector<128x128xbf16>,
    } else {
    }
    return
  }
  func.func @transform_0(%arg0: i32, %arg1: i32) -> (i32, i32) {
    %c0_i32 = arith.constant 0 : i32
    return %arg0, %arg1 : i32, i32
  }
  func.func @transform_1(%arg0: i32, %arg1: i32) -> (i32, i32) {
    %c0_i32 = arith.constant 0 : i32
    %c0_i32_0 = arith.constant 0 : i32
    return %arg1, %c0_i32 : i32, i32
  }
  func.func @transform_2(%arg0: i32, %arg1: i32) -> (i32, i32) {
    %c0_i32 = arith.constant 0 : i32
    %c0_i32_0 = arith.constant 0 : i32
    return %arg0, %c0_i32 : i32, i32
  }
  func.func @transform_3(%arg0: i32, %arg1: i32) -> (i32, i32) {
    %c0_i32 = arith.constant 0 : i32
    %c0_i32_0 = arith.constant 0 : i32
    return %arg0, %c0_i32 : i32, i32
  }
  func.func @transform_4(%arg0: i32, %arg1: i32) -> (i32, i32) {
    %c0_i32 = arith.constant 0 : i32
    %c0_i32_0 = arith.constant 0 : i32
    %c0_i32_1 = arith.constant 0 : i32
    return %c0_i32, %c0_i32_0 : i32, i32
  }
  func.func @transform_5(%arg0: i32, %arg1: i32) -> (i32, i32) {
    %c0_i32 = arith.constant 0 : i32
    %c0_i32_0 = arith.constant 0 : i32
    %c0_i32_1 = arith.constant 0 : i32
    return %c0_i32, %c0_i32_0 : i32, i32
  }
  func.func @transform_6(%arg0: i32, %arg1: i32) -> (i32, i32) {
    %c0_i32 = arith.constant 0 : i32
    %c0_i32_0 = arith.constant 0 : i32
    return %arg0, %c0_i32 : i32, i32
  }
}

module attributes {stable_mosaic.version = 11 : i64} {
  func.func @_sage_conv_kernel(%arg0: i32, %arg1: i32, %arg2: memref<128x256xi8, #tpu.memory_space<vmem>>, %arg3: memref<256x128xbf16, #tpu.memory_space<vmem>>, %arg4: memref<128x128xbf16, #tpu.memory_space<vmem>>, %arg5: memref<128x1xf32, #tpu.memory_space<vmem>>, %arg6: memref<256x128xbf16, #tpu.memory_space<vmem>>, %arg7: memref<1x128xf32, #tpu.memory_space<vmem>>, %arg8: memref<128x128xf32, #tpu.memory_space<vmem>>, %arg9: memref<128x128xf32, #tpu.memory_space<vmem>>) attributes {dimension_semantics = [#tpu.dimension_semantics<parallel>, #tpu.dimension_semantics<arbitrary>], iteration_bounds = array<i64: 2, 1>, scalar_prefetch = 0 : i64, scratch_operands = 1 : i64, tpu.core_type = #tpu.core_type<tc>, window_params = [{transform_indices = @transform_0, window_bounds = array<i64: 128, 256>}, {transform_indices = @transform_1, window_bounds = array<i64: 256, 128>}, {transform_indices = @transform_2, window_bounds = array<i64: 128, 128>}, {transform_indices = @transform_3, window_bounds = array<i64: 128, 1>}, {pipeline_mode = #tpu.pipeline_mode<synchronous>, transform_indices = @transform_4, window_bounds = array<i64: 256, 128>}, {pipeline_mode = #tpu.pipeline_mode<synchronous>, transform_indices = @transform_5, window_bounds = array<i64: 1, 128>}, {transform_indices = @transform_6, window_bounds = array<i64: 128, 128>}]} {
    %c0_i32 = arith.constant 0 : i32
    %0 = arith.cmpi eq, %arg1, %c0_i32 : i32
    %1 = arith.extui %0 : i1 to i32
    %c0_i32_0 = arith.constant 0 : i32
    %2 = arith.cmpi ne, %1, %c0_i32_0 : i32
    scf.if %2 {
      %cst_10 = arith.constant 0.000000e+00 : f32
      %13 = vector.broadcast %cst_10 : f32 to vector<128x128xf32>
      %c0_11 = arith.constant 0 : index
      %c0_12 = arith.constant 0 : index
      %14 = vector.load %arg9[%c0_11, %c0_12] : memref<128x128xf32, #tpu.memory_space<vmem>>, vector<128x128xf32>
      tpu.vector_store %arg9[%c0_11, %c0_12], %13 {strides = array<i32>} : memref<128x128xf32, #tpu.memory_space<vmem>>, vector<128x128xf32>,
    } else {
    }
    %c0 = arith.constant 0 : index
    %c0_1 = arith.constant 0 : index
    %3 = vector.load %arg2[%c0, %c0_1] : memref<128x256xi8, #tpu.memory_space<vmem>>, vector<128x256xi8>
    %4 = arith.sitofp %3 : vector<128x256xi8> to vector<128x256xbf16>
    %c0_2 = arith.constant 0 : index
    %c0_3 = arith.constant 0 : index
    %5 = vector.load %arg9[%c0_2, %c0_3] : memref<128x128xf32, #tpu.memory_space<vmem>>, vector<128x128xf32>
    %c0_4 = arith.constant 0 : index
    %c0_5 = arith.constant 0 : index
    %6 = vector.load %arg3[%c0_4, %c0_5] : memref<256x128xbf16, #tpu.memory_space<vmem>>, vector<256x128xbf16>
    %cst = arith.constant dense<0.000000e+00> : vector<128x128xf32>
    %7 = tpu.matmul %4, %6, %cst {dimension_numbers = #tpu.dot_dimension_numbers<[1], [0], [0], [1], [0, 0, 1, 1], [], []>} : vector<128x256xbf16>, vector<256x128xbf16>, vector<128x128xf32> -> vector<128x128xf32>
    %8 = arith.addf %5, %7 : vector<128x128xf32>
    %c0_6 = arith.constant 0 : index
    %c0_7 = arith.constant 0 : index
    %9 = vector.load %arg9[%c0_6, %c0_7] : memref<128x128xf32, #tpu.memory_space<vmem>>, vector<128x128xf32>
    tpu.vector_store %arg9[%c0_6, %c0_7], %8 {strides = array<i32>} : memref<128x128xf32, #tpu.memory_space<vmem>>, vector<128x128xf32>,
    %c0_i32_8 = arith.constant 0 : i32
    %10 = arith.cmpi eq, %arg1, %c0_i32_8 : i32
    %11 = arith.extui %10 : i1 to i32
    %c0_i32_9 = arith.constant 0 : i32
    %12 = arith.cmpi ne, %11, %c0_i32_9 : i32
    scf.if %12 {
      %c0_10 = arith.constant 0 : index
      %c0_11 = arith.constant 0 : index
      %13 = vector.load %arg9[%c0_10, %c0_11] : memref<128x128xf32, #tpu.memory_space<vmem>>, vector<128x128xf32>
      %c0_12 = arith.constant 0 : index
      %c0_13 = arith.constant 0 : index
      %14 = vector.load %arg5[%c0_12, %c0_13] : memref<128x1xf32, #tpu.memory_space<vmem>>, vector<128x1xf32>
      %15 = vector.broadcast %14 : vector<128x1xf32> to vector<128x128xf32>
      %16 = arith.mulf %13, %15 : vector<128x128xf32>
      %17 = arith.truncf %16 : vector<128x128xf32> to vector<128x128xbf16>
      %c0_14 = arith.constant 0 : index
      %c0_15 = arith.constant 0 : index
      %18 = vector.load %arg6[%c0_14, %c0_15] : memref<256x128xbf16, #tpu.memory_space<vmem>>, vector<128x128xbf16>
      %cst_16 = arith.constant dense<0.000000e+00> : vector<128x128xf32>
      %19 = tpu.matmul %17, %18, %cst_16 {dimension_numbers = #tpu.dot_dimension_numbers<[1], [0], [0], [1], [0, 0, 1, 1], [], []>} : vector<128x128xbf16>, vector<128x128xbf16>, vector<128x128xf32> -> vector<128x128xf32>
      %c0_17 = arith.constant 0 : index
      %c0_18 = arith.constant 0 : index
      %20 = vector.load %arg4[%c0_17, %c0_18] : memref<128x128xbf16, #tpu.memory_space<vmem>>, vector<128x128xbf16>
      %c128 = arith.constant 128 : index
      %c0_19 = arith.constant 0 : index
      %21 = vector.load %arg6[%c128, %c0_19] : memref<256x128xbf16, #tpu.memory_space<vmem>>, vector<128x128xbf16>
      %cst_20 = arith.constant dense<0.000000e+00> : vector<128x128xf32>
      %22 = tpu.matmul %20, %21, %cst_20 {dimension_numbers = #tpu.dot_dimension_numbers<[1], [0], [0], [1], [0, 0, 1, 1], [], []>} : vector<128x128xbf16>, vector<128x128xbf16>, vector<128x128xf32> -> vector<128x128xf32>
      %23 = arith.addf %19, %22 : vector<128x128xf32>
      %c0_21 = arith.constant 0 : index
      %c0_22 = arith.constant 0 : index
      %24 = vector.load %arg7[%c0_21, %c0_22] : memref<1x128xf32, #tpu.memory_space<vmem>>, vector<1x128xf32>
      %25 = vector.broadcast %24 : vector<1x128xf32> to vector<128x128xf32>
      %26 = arith.addf %23, %25 : vector<128x128xf32>
      %c0_23 = arith.constant 0 : index
      %c0_24 = arith.constant 0 : index
      %27 = vector.load %arg8[%c0_23, %c0_24] : memref<128x128xf32, #tpu.memory_space<vmem>>, vector<128x128xf32>
      tpu.vector_store %arg8[%c0_23, %c0_24], %26 {strides = array<i32>} : memref<128x128xf32, #tpu.memory_space<vmem>>, vector<128x128xf32>,
    } else {
    }
    return
  }
  func.func @transform_0(%arg0: i32, %arg1: i32) -> (i32, i32) {
    %c0_i32 = arith.constant 0 : i32
    return %arg0, %arg1 : i32, i32
  }
  func.func @transform_1(%arg0: i32, %arg1: i32) -> (i32, i32) {
    %c0_i32 = arith.constant 0 : i32
    %c0_i32_0 = arith.constant 0 : i32
    return %arg1, %c0_i32 : i32, i32
  }
  func.func @transform_2(%arg0: i32, %arg1: i32) -> (i32, i32) {
    %c0_i32 = arith.constant 0 : i32
    %c0_i32_0 = arith.constant 0 : i32
    return %arg0, %c0_i32 : i32, i32
  }
  func.func @transform_3(%arg0: i32, %arg1: i32) -> (i32, i32) {
    %c0_i32 = arith.constant 0 : i32
    %c0_i32_0 = arith.constant 0 : i32
    return %arg0, %c0_i32 : i32, i32
  }
  func.func @transform_4(%arg0: i32, %arg1: i32) -> (i32, i32) {
    %c0_i32 = arith.constant 0 : i32
    %c0_i32_0 = arith.constant 0 : i32
    %c0_i32_1 = arith.constant 0 : i32
    return %c0_i32, %c0_i32_0 : i32, i32
  }
  func.func @transform_5(%arg0: i32, %arg1: i32) -> (i32, i32) {
    %c0_i32 = arith.constant 0 : i32
    %c0_i32_0 = arith.constant 0 : i32
    %c0_i32_1 = arith.constant 0 : i32
    return %c0_i32, %c0_i32_0 : i32, i32
  }
  func.func @transform_6(%arg0: i32, %arg1: i32) -> (i32, i32) {
    %c0_i32 = arith.constant 0 : i32
    %c0_i32_0 = arith.constant 0 : i32
    return %arg0, %c0_i32 : i32, i32
  }
}

</mosaic_0001>

<bundles_post_ra>
// kernel: sage_forward.3
= control target key start
LH: loop header
LB: loop body
LE: loop exit
PB: predicated region body
PF: predicated region fallthrough
CT: control target
= control target key end

     0   :  { %s1706_s21 = smov 0   ;;  %s1708_s22 = smov 0   ;;  %s1912_s0 = inlined_call_operand.vmem [shape: s8[256,256], index: 0, kind: input, shape index: {}]   ;;  %s1913_s1 = inlined_call_operand.vmem [shape: bf16[256,128], index: 1, kind: input, shape index: {}, may-alias: {1,2}]   ;;  %s1914_s2 = inlined_call_operand.vmem [shape: bf16[256,128], index: 2, kind: input, shape index: {}, may-alias: {1,2}]   ;;  %s1915_s3 = inlined_call_operand.vmem [shape: f32[256,1], index: 3, kind: input, shape index: {}]   ;;  %s1916_s4 = inlined_call_operand.vmem [shape: bf16[256,128], index: 4, kind: input, shape index: {}]   ;;  %s1917_s5 = inlined_call_operand.vmem [shape: f32[1,128], index: 5, kind: input, shape index: {}]   ;;  %s1918_s6 = inlined_call_operand.vmem [shape: f32[256,128], index: 6, kind: output, shape index: {}]  }
   0x1   :  { %s1710_s23 = smov 0  }
   0x2 LB: > { %s28_s24 = sadd.s32 1, %s1664_s22  ;;  %p1349_p0 = scmp.ge.s32.totalorder %s1668_s23, 1  ;;  %s1668_s23 = sphi %s1710_s23, %s16_s23   ;;  %s1664_s22 = sphi %s1708_s22, %s1920_s22   ;;  %s1660_s21 = sphi %s1706_s21, %s1919_s21  }
   0x3   : > { %p30_p1 = scmp.ge.s32.totalorder %s28_s24, 2  ;;  %p266_p2 = scmp.lt.s32.totalorder %s1668_s23, 3 }
   0x5   : > { %s1922_s24 = smov (%p30_p1, %s28_s24), 0  ;;  %p267_p3 = pnand %p1349_p0, %p266_p2 }
   0x6   : > { %v1606_v0 = vld [vmem:[%s1913_s1 + $0x40] sm:$0xff] (!%p267_p3)   ;;  %s1350_s27 = sshll.u32 (!%p267_p3), %s1660_s21, 2  ;;  %v1608_v2 = vld [vmem:[%s1913_s1 + $0x48] sm:$0xff] (!%p267_p3)   ;;  %v1670_v4 = vmov (!%p267_p3), 0   ;;  %v1610_v5 = vld [vmem:[%s1913_s1 + $0x50] sm:$0xff] (!%p267_p3)   ;;  %s1353_s12 = sshll.u32 (!%p267_p3), %s1660_s21, 4 }
   0x7   : > { %270 = sbr.rel (%p267_p3) target bundleno = 534 (0x216), region = 44  ;;  %v1607_v1 = vld [vmem:[%s1913_s1] sm:$0xff] (!%p267_p3)   ;;  %p318_p4 = scmp.lt.s32.totalorder (!%p267_p3), %s1350_s27, 7  ;;  %1403 = vmatprep.subr.bf16.mxu0 (!%p267_p3), %v1606_v0  ;;  %v1609_v3 = vld [vmem:[%s1913_s1 + $0x8] sm:$0xff] (!%p267_p3)   ;;  %1604 = vset.pattern.permute.xlu0 (!%p267_p3), %v1670_v4  ;;  %v1611_v6 = vld [vmem:[%s1913_s1 + $0x10] sm:$0xff] (!%p267_p3)  }
   0x8   : > { %1404 = vmatpush3.bf16.msra.mxu0 (!%p267_p3), %v1607_v1  ;;  %1605 = vset.pattern.permute.xlu1 (!%p267_p3), %v1670_v4  ;;  %p335_p5 = scmp.lt.s32.totalorder (!%p267_p3), %s1353_s12, 31  ;;  %v1612_v7 = vld [vmem:[%s1913_s1 + $0x58] sm:$0xff] (!%p267_p3)   ;;  %v1614_v9 = vld [vmem:[%s1913_s1 + $0x60] sm:$0xff] (!%p267_p3)   ;;  %v1616_v11 = vld [vmem:[%s1913_s1 + $0x68] sm:$0xff] (!%p267_p3)  }
   0x9   : > { %1405 = vmatprep.subr.bf16.mxu0 (!%p267_p3), %v1608_v2  ;;  %v1613_v8 = vld [vmem:[%s1913_s1 + $0x18] sm:$0xff] (!%p267_p3)   ;;  %v1615_v10 = vld [vmem:[%s1913_s1 + $0x20] sm:$0xff] (!%p267_p3)   ;;  %v1617_v15 = vld [vmem:[%s1913_s1 + $0x28] sm:$0xff] (!%p267_p3)  }
   0xa   : > { %v1618_v17 = vld [vmem:[%s1913_s1 + $0x70] sm:$0xff] (!%p267_p3)   ;;  %v1620_v21 = vld [vmem:[%s1913_s1 + $0x78] sm:$0xff] (!%p267_p3)   ;;  %v1622_v23 = vld [vmem:[%s1916_s4 + $0x40] sm:$0xff] (!%p267_p3)  }
   0xb   : > { %v1619_v20 = vld [vmem:[%s1913_s1 + $0x30] sm:$0xff] (!%p267_p3)   ;;  %v1621_v24 = vld [vmem:[%s1913_s1 + $0x38] sm:$0xff] (!%p267_p3)   ;;  %v1623_v25 = vld [vmem:[%s1916_s4 + $0x48] sm:$0xff] (!%p267_p3)   ;;  %1499 = vmatprep.subr.bf16.mxu1 (!%p267_p3), %v1622_v23 }
   0xc   : > { %1406 = vmatpush3.bf16.msra.mxu0 (!%p267_p3), %v1609_v3  ;;  %1500 = vmatpush3.bf16.msra.mxu1 (!%p267_p3), %v1622_v23  ;;  %v1624_v28 = vld [vmem:[%s1916_s4 + $0x50] sm:$0xff] (!%p267_p3)   ;;  %v1625_v33 = vld [vmem:[%s1916_s4 + $0x58] sm:$0xff] (!%p267_p3)   ;;  %v1626_v38 = vld [vmem:[%s1916_s4 + $0x60] sm:$0xff] (!%p267_p3)  }
   0xd   : > { %1407 = vmatprep.subr.bf16.mxu0 (!%p267_p3), %v1610_v5  ;;  %1501 = vmatprep.subr.bf16.mxu1 (!%p267_p3), %v1623_v25  ;;  %v1627_v44 = vld [vmem:[%s1916_s4 + $0x68] sm:$0xff] (!%p267_p3)   ;;  %v1628_v47 = vld [vmem:[%s1916_s4 + $0x70] sm:$0xff] (!%p267_p3)   ;;  %v1629_v52 = vld [vmem:[%s1916_s4 + $0x78] sm:$0xff] (!%p267_p3)  }
   0xe   : > { %s1924_s27 = smov (!%p318_p4, %s1350_s27), 7  ;;  %s1926_s12 = smov (!%p335_p5, %s1353_s12), 31  ;;  %v1632_v54 = vld [vmem:[%s1916_s4] sm:$0xff]   ;;  %v1633_v58 = vld [vmem:[%s1916_s4 + $0x8] sm:$0xff]   ;;  %v1636_v61 = vld [vmem:[%s1916_s4 + $0x10] sm:$0xff]  }
   0xf   : > { %s1402_s17 = sshll.u32 %s1924_s27, 4  ;;  %s1356_s25 = sshll.u32 %s1926_s12, 3  ;;  %v1637_v1 = vld [vmem:[%s1916_s4 + $0x18] sm:$0xff]  }
  0x10   : > { %1408 = vmatpush3.bf16.msra.mxu0 %v1611_v6  ;;  %s1761_s29 = scalar_lea.vmem %s1912_s0, %s1402_s17  ;;  %s1771_s9 = scalar_lea.vmem %s1915_s3, %s1356_s25  ;;  %1502 = vmatpush3.bf16.msra.mxu1 %v1623_v25 }
  0x11   : > { %1409 = vmatprep.subr.bf16.mxu0 %v1612_v7  ;;  %v374_v12 = vld [vmem:[%s1761_s29 + $0x8] sm:$0xff]  ;;  %v689_v14 = vld [vmem:[%s1771_s9] sm:$0xff]  ;;  %v691_v16 = vld [vmem:[%s1771_s9 + $0x10] sm:$0xff]  ;;  %s1354_s8 = sshll.u32 %s1926_s12, 2  ;;  %1503 = vmatprep.subr.bf16.mxu1 %v1624_v28 }
  0x12   : > { %v382_v13 = vunpack.c.l.s8.bf16 %v374_v12  ;;  %707 = vperm.xlu0 %1604, %v689_v14   ;;  %717 = vperm.xlu1 %1605, %v691_v16   ;;  %v690_v18 = vld [vmem:[%s1771_s9 + $0x8] sm:$0xff]  ;;  %v692_v19 = vld [vmem:[%s1771_s9 + $0x18] sm:$0xff]  ;;  %v693_v22 = vld [vmem:[%s1771_s9 + $0x20] sm:$0xff]  ;;  %s1813_s15 = scalar_lea.vmem %s1914_s2, %s1354_s8  ;;  %v384_v32 = vunpack.c.h.s8.bf16 %v374_v12  ;;  %s1885_s8 = scalar_lea.vmem %s1918_s6, %s1356_s25 }
  0x13   : > { %v694_v26 = vld [vmem:[%s1771_s9 + $0x28] sm:$0xff]  ;;  %v373_v27 = vld [vmem:[%s1761_s29] sm:$0xff]  ;;  %v695_v29 = vld [vmem:[%s1771_s9 + $0x30] sm:$0xff] }
  0x14   : > { %1410 = vmatpush3.bf16.msra.mxu0 %v1613_v8  ;;  %573 = vmatprep.mubr.bf16.mxu0 %v382_v13  ;;  %v381_v30 = vunpack.c.l.s8.bf16 %v373_v27  ;;  %v696_v31 = vld [vmem:[%s1771_s9 + $0x38] sm:$0xff]  ;;  %v1630_v34 = vld [vmem:[%s1813_s15] sm:$0xff]   ;;  %v698_v36 = vld [vmem:[%s1771_s9 + $0x48] sm:$0xff]  ;;  %v383_v40 = vunpack.c.h.s8.bf16 %v373_v27 }
  0x15   : > { %1411 = vmatprep.subr.bf16.mxu0 %v1614_v9  ;;  %v697_v35 = vld [vmem:[%s1771_s9 + $0x40] sm:$0xff]  ;;  %1515 = vmatprep.mubr.bf16.mxu1 %v1630_v34  ;;  %v376_v37 = vld [vmem:[%s1761_s29 + $0x18] sm:$0xff]  ;;  %v699_v39 = vld [vmem:[%s1771_s9 + $0x50] sm:$0xff] }
  0x16   : > { %712 = vperm.xlu0 %1604, %v690_v18   ;;  %722 = vperm.xlu1 %1605, %v692_v19   ;;  %v700_v41 = vld [vmem:[%s1771_s9 + $0x58] sm:$0xff]  ;;  %v386_v42 = vunpack.c.l.s8.bf16 %v376_v37  ;;  %v701_v43 = vld [vmem:[%s1771_s9 + $0x60] sm:$0xff]  ;;  %v702_v45 = vld [vmem:[%s1771_s9 + $0x68] sm:$0xff]  ;;  %v388_v51 = vunpack.c.h.s8.bf16 %v376_v37 }
  0x17   : > { %1504 = vmatpush3.bf16.msra.mxu1 %v1624_v28  ;;  %v375_v46 = vld [vmem:[%s1761_s29 + $0x10] sm:$0xff]  ;;  %v704_v50 = vld [vmem:[%s1771_s9 + $0x78] sm:$0xff]  ;;  %v378_v53 = vld [vmem:[%s1761_s29 + $0x28] sm:$0xff] }
  0x18   : > { %1412 = vmatpush3.bf16.msra.mxu0 %v1615_v10  ;;  %1505 = vmatprep.subr.bf16.mxu1 %v1625_v33  ;;  %v703_v48 = vld [vmem:[%s1771_s9 + $0x70] sm:$0xff]  ;;  %v385_v49 = vunpack.c.l.s8.bf16 %v375_v46  ;;  %v387_v55 = vunpack.c.h.s8.bf16 %v375_v46  ;;  %v1631_v56 = vld [vmem:[%s1813_s15 + $0x8] sm:$0xff]   ;;  %v390_v57 = vunpack.c.l.s8.bf16 %v378_v53  ;;  %v377_v60 = vld [vmem:[%s1761_s29 + $0x20] sm:$0xff]  ;;  %v392_v0 = vunpack.c.h.s8.bf16 %v378_v53 }
  0x19   : > { %1413 = vmatprep.subr.bf16.mxu0 %v1616_v11  ;;  %v1634_v59 = vld [vmem:[%s1813_s15 + $0x10] sm:$0xff]   ;;  %v389_v62 = vunpack.c.l.s8.bf16 %v377_v60  ;;  %v1635_v63 = vld [vmem:[%s1813_s15 + $0x18] sm:$0xff]   ;;  %v391_v3 = vunpack.c.h.s8.bf16 %v377_v60  ;;  %v1638_v9 = vld [vmem:[%s1813_s15 + $0x20] sm:$0xff]  }
  0x1a   : > { %727 = vperm.xlu0 %1604, %v693_v22   ;;  %732 = vperm.xlu1 %1605, %v694_v26   ;;  %v380_v2 = vld [vmem:[%s1761_s29 + $0x38] sm:$0xff]  ;;  %v379_v5 = vld [vmem:[%s1761_s29 + $0x30] sm:$0xff]  ;;  %v1639_v10 = vld [vmem:[%s1813_s15 + $0x28] sm:$0xff]  }
  0x1b   : > { %1506 = vmatpush3.bf16.msra.mxu1 %v1625_v33  ;;  %v394_v4 = vunpack.c.l.s8.bf16 %v380_v2  ;;  %v393_v6 = vunpack.c.l.s8.bf16 %v379_v5  ;;  %v396_v7 = vunpack.c.h.s8.bf16 %v380_v2  ;;  %v395_v8 = vunpack.c.h.s8.bf16 %v379_v5  ;;  %v1640_v11 = vld [vmem:[%s1916_s4 + $0x20] sm:$0xff]   ;;  %v1641_v12 = vld [vmem:[%s1916_s4 + $0x28] sm:$0xff]   ;;  %v1642_v13 = vld [vmem:[%s1813_s15 + $0x30] sm:$0xff]  }
  0x1c   : > { %1414 = vmatpush3.bf16.msra.mxu0 %v1617_v15  ;;  %1507 = vmatprep.subr.bf16.mxu1 %v1626_v38  ;;  %v1643_v14 = vld [vmem:[%s1813_s15 + $0x38] sm:$0xff]   ;;  %v1644_v15 = vld [vmem:[%s1916_s4 + $0x30] sm:$0xff]  }
  0x1d   : > { %1415 = vmatprep.subr.bf16.mxu0 %v1618_v17  ;;  %v1645_v16 = vld [vmem:[%s1916_s4 + $0x38] sm:$0xff]  }
  0x1e   : > { %737 = vperm.xlu0 %1604, %v695_v29   ;;  %742 = vperm.xlu1 %1605, %v696_v31  }
  0x1f   : > { %1508 = vmatpush3.bf16.msra.mxu1 %v1626_v38 }
  0x20   : > { %1416 = vmatpush3.bf16.msra.mxu0 %v1619_v20  ;;  %1509 = vmatprep.subr.bf16.mxu1 %v1627_v44 }
  0x21   : > { %1417 = vmatprep.subr.bf16.mxu0 %v1620_v21 }
  0x22   : > { %747 = vperm.xlu0 %1604, %v697_v35   ;;  %752 = vperm.xlu1 %1605, %v698_v36  }
  0x23   : > { %1510 = vmatpush3.bf16.msra.mxu1 %v1627_v44 }
  0x24   : > { %1418 = vmatpush3.bf16.msra.mxu0 %v1621_v24  ;;  %1511 = vmatprep.subr.bf16.mxu1 %v1628_v47 }
  0x26   : > { %757 = vperm.xlu0 %1604, %v699_v39   ;;  %762 = vperm.xlu1 %1605, %v700_v41  }
  0x27   : > { %574 = vmatmul.mubr.bf16.vlgmr.msra.gmra.mrb[0].mxu0 %v381_v30  ;;  %1512 = vmatpush3.bf16.msra.mxu1 %v1628_v47 }
  0x28   : > { %581 = vmatprep.mubr.bf16.mxu0 %v384_v32  ;;  %1513 = vmatprep.subr.bf16.mxu1 %v1629_v52 }
  0x2a   : > { %767 = vperm.xlu0 %1604, %v701_v43   ;;  %772 = vperm.xlu1 %1605, %v702_v45  }
  0x2b   : > { %1514 = vmatpush3.bf16.msra.mxu1 %v1629_v52 }
  0x2c   : > { %1531 = vmatprep.subr.bf16.mxu1 %v1632_v54 }
  0x2e   : > { %777 = vperm.xlu0 %1604, %v703_v48   ;;  %782 = vperm.xlu1 %1605, %v704_v50  }
  0x2f   : > { %582 = vmatmul.mubr.bf16.gmra.mrb[4].mxu0 %v383_v40  ;;  %1516 = vmatmul.mubr.bf16.vlgmr.msra.gmra.mrb[0].mxu1 %v1631_v56 }
  0x30   : > { %589 = vmatprep.mubr.bf16.mxu0 %v386_v42  ;;  %1532 = vmatpush3.bf16.msra.mxu1 %v1632_v54 }
  0x31   : > { %1533 = vmatprep.subr.bf16.mxu1 %v1633_v58  ;;  %1519 = vmatprep.mubr.bf16.mxu1 %v1634_v59 }
  0x34   : > { %1534 = vmatpush3.bf16.msra.mxu1 %v1633_v58 }
  0x35   : > { %1535 = vmatprep.subr.bf16.mxu1 %v1636_v61 }
  0x37   : > { %590 = vmatmul.mubr.bf16.gmra.mrb[8].mxu0 %v385_v49  ;;  %1520 = vmatmul.mubr.bf16.gmra.mrb[4].mxu1 %v1635_v63 }
  0x38   : > { %597 = vmatprep.mubr.bf16.mxu0 %v388_v51  ;;  %1536 = vmatpush3.bf16.msra.mxu1 %v1636_v61 }
  0x39   : > { %1537 = vmatprep.subr.bf16.mxu1 %v1637_v1  ;;  %1523 = vmatprep.mubr.bf16.mxu1 %v1638_v9 }
  0x3c   : > { %1538 = vmatpush3.bf16.msra.mxu1 %v1637_v1 }
  0x3d   : > { %1539 = vmatprep.subr.bf16.mxu1 %v1640_v11 }
  0x3f   : > { %598 = vmatmul.mubr.bf16.gmra.mrb[12].mxu0 %v387_v55  ;;  %1524 = vmatmul.mubr.bf16.gmra.mrb[8].mxu1 %v1639_v10 }
  0x40   : > { %605 = vmatprep.mubr.bf16.mxu0 %v390_v57  ;;  %1540 = vmatpush3.bf16.msra.mxu1 %v1640_v11 }
  0x41   : > { %1541 = vmatprep.subr.bf16.mxu1 %v1641_v12  ;;  %1527 = vmatprep.mubr.bf16.mxu1 %v1642_v13 }
  0x44   : > { %1542 = vmatpush3.bf16.msra.mxu1 %v1641_v12 }
  0x45   : > { %1543 = vmatprep.subr.bf16.mxu1 %v1644_v15 }
  0x47   : > { %606 = vmatmul.mubr.bf16.gmra.mrb[16].mxu0 %v389_v62  ;;  %1528 = vmatmul.mubr.bf16.gmra.mrb[12].mxu1 %v1643_v14 }
  0x48   : > { %613 = vmatprep.mubr.bf16.mxu0 %v392_v0  ;;  %1544 = vmatpush3.bf16.msra.mxu1 %v1644_v15 }
  0x49   : > { %1545 = vmatprep.subr.bf16.mxu1 %v1645_v16 }
  0x4c   : > { %1546 = vmatpush3.bf16.msra.mxu1 %v1645_v16 }
  0x4f   : > { %614 = vmatmul.mubr.bf16.gmra.mrb[20].mxu0 %v391_v3 }
  0x50   : > { %621 = vmatprep.mubr.bf16.mxu0 %v394_v4 }
  0x57   : > { %622 = vmatmul.mubr.bf16.gmra.mrb[24].mxu0 %v393_v6 }
  0x58   : > { %629 = vmatprep.mubr.bf16.mxu0 %v396_v7 }
  0x5f   : > { %630 = vmatmul.mubr.bf16.gmra.mrb[28].mxu0 %v395_v8 }
  0x91   : > { %v708_v17 = vpop.permute.xlu0 %707  ;;  %v718_v27 = vpop.permute.xlu1 %717 }
  0x95   : > { %v713_v23 = vpop.permute.xlu0 %712  ;;  %v723_v35 = vpop.permute.xlu1 %722 }
  0x99   : > { %v728_v45 = vpop.permute.xlu0 %727  ;;  %v733_v46 = vpop.permute.xlu1 %732 }
  0x9d   : > { %v738_v56 = vpop.permute.xlu0 %737  ;;  %v743_v57 = vpop.permute.xlu1 %742 }
  0xa1   : > { %v748_v3 = vpop.permute.xlu0 %747  ;;  %v753_v4 = vpop.permute.xlu1 %752 }
  0xa5   : > { %v758_v14 = vpop.permute.xlu0 %757  ;;  %v763_v15 = vpop.permute.xlu1 %762 }
  0xfa   : > { %v1419_v18 = vpop.f32.mrb[0].mxu0 }
  0xfb   : > { %v1420_v19 = vpop.f32.mrb[1].mxu0 }
  0xfc   : > { %v1421_v20 = vadd.f32 %v1420_v19, %v1419_v18  ;;  %v1422_v21 = vpop.f32.mrb[2].mxu0 }
  0xfd   : > { %v1423_v22 = vpop.f32.mrb[3].mxu0 }
  0xfe   : > { %v1424_v24 = vadd.f32 %v1423_v22, %v1422_v21  ;;  %v785_v25 = vmul.f32 %v1421_v20, %v708_v17 }
 0x100   : > { %v786_v26 = vmul.f32 %v1424_v24, %v713_v23 }
 0x102   : > { %v801_v28 = vpack.c.bf16 %v786_v26, %v785_v25  ;;  %v1425_v29 = vpop.f32.mrb[4].mxu0  ;;  %v768_v25 = vpop.permute.xlu0 %767 }
 0x103   : > { %v1426_v30 = vpop.f32.mrb[5].mxu0  ;;  %v773_v26 = vpop.permute.xlu1 %772 }
 0x104   : > { %v1427_v31 = vadd.f32 %v1426_v30, %v1425_v29  ;;  %v1428_v32 = vpop.f32.mrb[6].mxu0  ;;  %1547 = vmatprep.mubr.bf16.mxu1 %v801_v28 }
 0x105   : > { %v1429_v33 = vpop.f32.mrb[7].mxu0 }
 0x106   : > { %v1430_v34 = vadd.f32 %v1429_v33, %v1428_v32  ;;  %v787_v36 = vmul.f32 %v1427_v31, %v718_v27 }
 0x108   : > { %v788_v37 = vmul.f32 %v1430_v34, %v723_v35 }
 0x10a   : > { %v802_v38 = vpack.c.bf16 %v788_v37, %v787_v36  ;;  %v1431_v39 = vpop.f32.mrb[8].mxu0  ;;  %v778_v36 = vpop.permute.xlu0 %777 }
 0x10b   : > { %v1432_v40 = vpop.f32.mrb[9].mxu0  ;;  %v783_v37 = vpop.permute.xlu1 %782 }
 0x10c   : > { %v1433_v41 = vadd.f32 %v1432_v40, %v1431_v39  ;;  %v1434_v42 = vpop.f32.mrb[10].mxu0  ;;  %1548 = vmatmul.mubr.bf16.vlgmr.msra.gmra.mrb[0].mxu1 %v802_v38 }
 0x10d   : > { %v1435_v43 = vpop.f32.mrb[11].mxu0 }
 0x10e   : > { %v1436_v44 = vadd.f32 %v1435_v43, %v1434_v42  ;;  %v789_v47 = vmul.f32 %v1433_v41, %v728_v45  ;;  %v1399_v41 = vld [vmem:[%s1917_s5] ss:$0 sm:$0xff] }
 0x110   : > { %v790_v48 = vmul.f32 %v1436_v44, %v733_v46 }
 0x112   : > { %v1437_v49 = vpop.f32.mrb[12].mxu0  ;;  %v803_v50 = vpack.c.bf16 %v790_v48, %v789_v47 }
 0x113   : > { %v1438_v51 = vpop.f32.mrb[13].mxu0 }
 0x114   : > { %v1439_v52 = vadd.f32 %v1438_v51, %v1437_v49  ;;  %v1440_v53 = vpop.f32.mrb[14].mxu0  ;;  %1551 = vmatprep.mubr.bf16.mxu1 %v803_v50 }
 0x115   : > { %v1441_v54 = vpop.f32.mrb[15].mxu0 }
 0x116   : > { %v1442_v55 = vadd.f32 %v1441_v54, %v1440_v53  ;;  %v791_v58 = vmul.f32 %v1439_v52, %v738_v56 }
 0x118   : > { %v792_v59 = vmul.f32 %v1442_v55, %v743_v57 }
 0x11a   : > { %v1443_v60 = vpop.f32.mrb[16].mxu0  ;;  %v804_v61 = vpack.c.bf16 %v792_v59, %v791_v58 }
 0x11b   : > { %v1444_v62 = vpop.f32.mrb[17].mxu0 }
 0x11c   : > { %v1445_v63 = vadd.f32 %v1444_v62, %v1443_v60  ;;  %v1446_v0 = vpop.f32.mrb[18].mxu0  ;;  %1552 = vmatmul.mubr.bf16.gmra.mrb[4].mxu1 %v804_v61 }
 0x11d   : > { %v1447_v1 = vpop.f32.mrb[19].mxu0 }
 0x11e   : > { %v1448_v2 = vadd.f32 %v1447_v1, %v1446_v0  ;;  %v793_v5 = vmul.f32 %v1445_v63, %v748_v3 }
 0x120   : > { %v794_v6 = vmul.f32 %v1448_v2, %v753_v4 }
 0x122   : > { %v1449_v7 = vpop.f32.mrb[20].mxu0  ;;  %v805_v8 = vpack.c.bf16 %v794_v6, %v793_v5 }
 0x123   : > { %v1450_v9 = vpop.f32.mrb[21].mxu0 }
 0x124   : > { %v1451_v10 = vadd.f32 %v1450_v9, %v1449_v7  ;;  %v1452_v11 = vpop.f32.mrb[22].mxu0  ;;  %1555 = vmatprep.mubr.bf16.mxu1 %v805_v8 }
 0x125   : > { %v1453_v12 = vpop.f32.mrb[23].mxu0 }
 0x126   : > { %v1454_v13 = vadd.f32 %v1453_v12, %v1452_v11  ;;  %v795_v16 = vmul.f32 %v1451_v10, %v758_v14 }
 0x128   : > { %v796_v17 = vmul.f32 %v1454_v13, %v763_v15 }
 0x12a   : > { %v1455_v18 = vpop.f32.mrb[24].mxu0  ;;  %v806_v19 = vpack.c.bf16 %v796_v17, %v795_v16 }
 0x12b   : > { %v1456_v20 = vpop.f32.mrb[25].mxu0 }
 0x12c   : > { %v1457_v21 = vadd.f32 %v1456_v20, %v1455_v18  ;;  %v1458_v22 = vpop.f32.mrb[26].mxu0  ;;  %1556 = vmatmul.mubr.bf16.gmra.mrb[8].mxu1 %v806_v19 }
 0x12d   : > { %v1459_v23 = vpop.f32.mrb[27].mxu0 }
 0x12e   : > { %v1460_v24 = vadd.f32 %v1459_v23, %v1458_v22  ;;  %v797_v27 = vmul.f32 %v1457_v21, %v768_v25 }
 0x130   : > { %v798_v28 = vmul.f32 %v1460_v24, %v773_v26 }
 0x132   : > { %v1461_v29 = vpop.f32.mrb[28].mxu0  ;;  %v807_v30 = vpack.c.bf16 %v798_v28, %v797_v27 }
 0x133   : > { %v1462_v31 = vpop.f32.mrb[29].mxu0 }
 0x134   : > { %v1463_v32 = vadd.f32 %v1462_v31, %v1461_v29  ;;  %v1464_v33 = vpop.f32.mrb[30].mxu0  ;;  %1559 = vmatprep.mubr.bf16.mxu1 %v807_v30 }
 0x135   : > { %v1465_v34 = vpop.f32.mrb[31].mxu0 }
 0x136   : > { %v1466_v35 = vadd.f32 %v1465_v34, %v1464_v33  ;;  %v799_v38 = vmul.f32 %v1463_v32, %v778_v36 }
 0x138   : > { %v800_v39 = vmul.f32 %v1466_v35, %v783_v37 }
 0x13a   : > { %v808_v40 = vpack.c.bf16 %v800_v39, %v799_v38 }
 0x13c   : > { %1560 = vmatmul.mubr.bf16.gmra.mrb[12].mxu1 %v808_v40 }
 0x1df   : > { %v1549_v42 = vpop.f32.mrb[0].mxu1 }
 0x1e0   : > { %v1204_v43 = vadd.f32 %v1549_v42, %v1399_v41  ;;  %v1132_v44 = vpop.f32.mrb[1].mxu1 }
 0x1e1   : > { %v1202_v45 = vadd.f32 %v1399_v41, %v1132_v44  ;;  %v1550_v46 = vpop.f32.mrb[2].mxu1 }
 0x1e2   : > { %1220 = vst [vmem:[%s1885_s8 + $0x10] sm:$0xff] %v1204_v43  ;;  %v1205_v47 = vadd.f32 %v1550_v46, %v1399_v41  ;;  %v1135_v48 = vpop.f32.mrb[3].mxu1 }
 0x1e3   : > { %1218 = vst [vmem:[%s1885_s8] sm:$0xff] %v1202_v45  ;;  %v1203_v49 = vadd.f32 %v1399_v41, %v1135_v48 }
 0x1e4   : > { %1221 = vst [vmem:[%s1885_s8 + $0x18] sm:$0xff] %v1205_v47 }
 0x1e5   : > { %1219 = vst [vmem:[%s1885_s8 + $0x8] sm:$0xff] %v1203_v49 }
 0x1ef   : > { %v1553_v50 = vpop.f32.mrb[4].mxu1 }
 0x1f0   : > { %v1208_v51 = vadd.f32 %v1553_v50, %v1399_v41  ;;  %v1148_v52 = vpop.f32.mrb[5].mxu1 }
 0x1f1   : > { %v1206_v53 = vadd.f32 %v1399_v41, %v1148_v52  ;;  %v1554_v54 = vpop.f32.mrb[6].mxu1 }
 0x1f2   : > { %1224 = vst [vmem:[%s1885_s8 + $0x30] sm:$0xff] %v1208_v51  ;;  %v1209_v55 = vadd.f32 %v1554_v54, %v1399_v41  ;;  %v1151_v56 = vpop.f32.mrb[7].mxu1 }
 0x1f3   : > { %1222 = vst [vmem:[%s1885_s8 + $0x20] sm:$0xff] %v1206_v53  ;;  %v1207_v57 = vadd.f32 %v1399_v41, %v1151_v56 }
 0x1f4   : > { %1225 = vst [vmem:[%s1885_s8 + $0x38] sm:$0xff] %v1209_v55 }
 0x1f5   : > { %1223 = vst [vmem:[%s1885_s8 + $0x28] sm:$0xff] %v1207_v57 }
 0x1ff   : > { %v1557_v58 = vpop.f32.mrb[8].mxu1 }
 0x200   : > { %v1212_v59 = vadd.f32 %v1557_v58, %v1399_v41  ;;  %v1164_v60 = vpop.f32.mrb[9].mxu1 }
 0x201   : > { %v1210_v61 = vadd.f32 %v1399_v41, %v1164_v60  ;;  %v1558_v62 = vpop.f32.mrb[10].mxu1 }
 0x202   : > { %1228 = vst [vmem:[%s1885_s8 + $0x50] sm:$0xff] %v1212_v59  ;;  %v1213_v63 = vadd.f32 %v1558_v62, %v1399_v41  ;;  %v1167_v0 = vpop.f32.mrb[11].mxu1 }
 0x203   : > { %1226 = vst [vmem:[%s1885_s8 + $0x40] sm:$0xff] %v1210_v61  ;;  %v1211_v1 = vadd.f32 %v1399_v41, %v1167_v0 }
 0x204   : > { %1229 = vst [vmem:[%s1885_s8 + $0x58] sm:$0xff] %v1213_v63 }
 0x205   : > { %1227 = vst [vmem:[%s1885_s8 + $0x48] sm:$0xff] %v1211_v1 }
 0x20f   : > { %v1561_v2 = vpop.f32.mrb[12].mxu1 }
 0x210   : > { %v1216_v3 = vadd.f32 %v1561_v2, %v1399_v41  ;;  %v1180_v4 = vpop.f32.mrb[13].mxu1 }
 0x211   : > { %v1214_v5 = vadd.f32 %v1399_v41, %v1180_v4  ;;  %v1562_v6 = vpop.f32.mrb[14].mxu1 }
 0x212   : > { %1232 = vst [vmem:[%s1885_s8 + $0x70] sm:$0xff] %v1216_v3  ;;  %v1217_v7 = vadd.f32 %v1562_v6, %v1399_v41  ;;  %v1183_v8 = vpop.f32.mrb[15].mxu1 }
 0x213   : > { %1230 = vst [vmem:[%s1885_s8 + $0x60] sm:$0xff] %v1214_v5  ;;  %v1215_v9 = vadd.f32 %v1399_v41, %v1183_v8 }
 0x214   : > { %1233 = vst [vmem:[%s1885_s8 + $0x78] sm:$0xff] %v1217_v7 }
 0x215   : > { %1231 = vst [vmem:[%s1885_s8 + $0x68] sm:$0xff] %v1215_v9 }
 0x216 PF: > { %s16_s23 = sadd.s32 1, %s1668_s23   ;;  %s1919_s21 = smov %s1664_s22 }
 0x217   : > { %p13_p6 = scmp.ge.s32.totalorder %s16_s23, 4   ;;  %s1920_s22 = smov %s1922_s24 }
 0x219   :  { %15 = sbr.rel (!%p13_p6) target bundleno = 2 (0x2), region = 91 }

// kernel: sage_forward.2
= control target key start
LH: loop header
LB: loop body
LE: loop exit
PB: predicated region body
PF: predicated region fallthrough
CT: control target
= control target key end

     0   :  { %s1865_s21 = smov 0   ;;  %s1867_s22 = smov 0   ;;  %s2063_s0 = inlined_call_operand.vmem [shape: s8[256,256], index: 0, kind: input, shape index: {}]   ;;  %s2064_s1 = inlined_call_operand.vmem [shape: bf16[256,128], index: 1, kind: input, shape index: {}, may-alias: {1,2}]   ;;  %s2065_s2 = inlined_call_operand.vmem [shape: bf16[256,128], index: 2, kind: input, shape index: {}, may-alias: {1,2}]   ;;  %s2066_s3 = inlined_call_operand.vmem [shape: f32[256,1], index: 3, kind: input, shape index: {}]   ;;  %s2067_s4 = inlined_call_operand.vmem [shape: bf16[256,128], index: 4, kind: input, shape index: {}]   ;;  %s2068_s5 = inlined_call_operand.vmem [shape: f32[1,128], index: 5, kind: input, shape index: {}]   ;;  %s2069_s6 = inlined_call_operand.vmem [shape: bf16[256,128], index: 6, kind: output, shape index: {}]  }
   0x1   :  { %s1869_s23 = smov 0  }
   0x2 LB: > { %s28_s24 = sadd.s32 1, %s1823_s22  ;;  %p1429_p0 = scmp.ge.s32.totalorder %s1827_s23, 1  ;;  %s1827_s23 = sphi %s1869_s23, %s16_s23   ;;  %s1823_s22 = sphi %s1867_s22, %s2071_s22   ;;  %s1819_s21 = sphi %s1865_s21, %s2070_s21  }
   0x3   : > { %p30_p1 = scmp.ge.s32.totalorder %s28_s24, 2  ;;  %p266_p2 = scmp.lt.s32.totalorder %s1827_s23, 3 }
   0x5   : > { %s2073_s24 = smov (%p30_p1, %s28_s24), 0  ;;  %p267_p3 = pnand %p1429_p0, %p266_p2 }
   0x6   : > { %v1765_v0 = vld [vmem:[%s2064_s1 + $0x40] sm:$0xff] (!%p267_p3)   ;;  %s1430_s27 = sshll.u32 (!%p267_p3), %s1819_s21, 2  ;;  %v1767_v2 = vld [vmem:[%s2064_s1 + $0x48] sm:$0xff] (!%p267_p3)   ;;  %v1829_v4 = vmov (!%p267_p3), 0   ;;  %v1769_v5 = vld [vmem:[%s2064_s1 + $0x50] sm:$0xff] (!%p267_p3)   ;;  %s1433_s12 = sshll.u32 (!%p267_p3), %s1819_s21, 4 }
   0x7   : > { %270 = sbr.rel (%p267_p3) target bundleno = 538 (0x21a), region = 44  ;;  %v1766_v1 = vld [vmem:[%s2064_s1] sm:$0xff] (!%p267_p3)   ;;  %p318_p4 = scmp.lt.s32.totalorder (!%p267_p3), %s1430_s27, 7  ;;  %1562 = vmatprep.subr.bf16.mxu0 (!%p267_p3), %v1765_v0  ;;  %v1768_v3 = vld [vmem:[%s2064_s1 + $0x8] sm:$0xff] (!%p267_p3)   ;;  %1763 = vset.pattern.permute.xlu0 (!%p267_p3), %v1829_v4  ;;  %v1770_v6 = vld [vmem:[%s2064_s1 + $0x10] sm:$0xff] (!%p267_p3)  }
   0x8   : > { %1563 = vmatpush3.bf16.msra.mxu0 (!%p267_p3), %v1766_v1  ;;  %1764 = vset.pattern.permute.xlu1 (!%p267_p3), %v1829_v4  ;;  %p335_p5 = scmp.lt.s32.totalorder (!%p267_p3), %s1433_s12, 31  ;;  %v1771_v7 = vld [vmem:[%s2064_s1 + $0x58] sm:$0xff] (!%p267_p3)   ;;  %v1773_v9 = vld [vmem:[%s2064_s1 + $0x60] sm:$0xff] (!%p267_p3)   ;;  %v1775_v11 = vld [vmem:[%s2064_s1 + $0x68] sm:$0xff] (!%p267_p3)  }
   0x9   : > { %1564 = vmatprep.subr.bf16.mxu0 (!%p267_p3), %v1767_v2  ;;  %v1772_v8 = vld [vmem:[%s2064_s1 + $0x18] sm:$0xff] (!%p267_p3)   ;;  %v1774_v10 = vld [vmem:[%s2064_s1 + $0x20] sm:$0xff] (!%p267_p3)   ;;  %v1776_v15 = vld [vmem:[%s2064_s1 + $0x28] sm:$0xff] (!%p267_p3)  }
   0xa   : > { %v1777_v17 = vld [vmem:[%s2064_s1 + $0x70] sm:$0xff] (!%p267_p3)   ;;  %v1779_v21 = vld [vmem:[%s2064_s1 + $0x78] sm:$0xff] (!%p267_p3)   ;;  %v1781_v23 = vld [vmem:[%s2067_s4 + $0x40] sm:$0xff] (!%p267_p3)  }
   0xb   : > { %v1778_v20 = vld [vmem:[%s2064_s1 + $0x30] sm:$0xff] (!%p267_p3)   ;;  %v1780_v24 = vld [vmem:[%s2064_s1 + $0x38] sm:$0xff] (!%p267_p3)   ;;  %v1782_v25 = vld [vmem:[%s2067_s4 + $0x48] sm:$0xff] (!%p267_p3)   ;;  %1658 = vmatprep.subr.bf16.mxu1 (!%p267_p3), %v1781_v23 }
   0xc   : > { %1565 = vmatpush3.bf16.msra.mxu0 (!%p267_p3), %v1768_v3  ;;  %1659 = vmatpush3.bf16.msra.mxu1 (!%p267_p3), %v1781_v23  ;;  %v1783_v28 = vld [vmem:[%s2067_s4 + $0x50] sm:$0xff] (!%p267_p3)   ;;  %v1784_v33 = vld [vmem:[%s2067_s4 + $0x58] sm:$0xff] (!%p267_p3)   ;;  %v1785_v38 = vld [vmem:[%s2067_s4 + $0x60] sm:$0xff] (!%p267_p3)  }
   0xd   : > { %1566 = vmatprep.subr.bf16.mxu0 (!%p267_p3), %v1769_v5  ;;  %1660 = vmatprep.subr.bf16.mxu1 (!%p267_p3), %v1782_v25  ;;  %v1786_v44 = vld [vmem:[%s2067_s4 + $0x68] sm:$0xff] (!%p267_p3)   ;;  %v1787_v47 = vld [vmem:[%s2067_s4 + $0x70] sm:$0xff] (!%p267_p3)   ;;  %v1788_v52 = vld [vmem:[%s2067_s4 + $0x78] sm:$0xff] (!%p267_p3)  }
   0xe   : > { %s2075_s27 = smov (!%p318_p4, %s1430_s27), 7  ;;  %s2077_s12 = smov (!%p335_p5, %s1433_s12), 31  ;;  %v1791_v54 = vld [vmem:[%s2067_s4] sm:$0xff]   ;;  %v1792_v58 = vld [vmem:[%s2067_s4 + $0x8] sm:$0xff]   ;;  %v1795_v61 = vld [vmem:[%s2067_s4 + $0x10] sm:$0xff]  }
   0xf   : > { %s1498_s17 = sshll.u32 %s2075_s27, 4  ;;  %s1436_s25 = sshll.u32 %s2077_s12, 3  ;;  %v1796_v1 = vld [vmem:[%s2067_s4 + $0x18] sm:$0xff]  }
  0x10   : > { %1567 = vmatpush3.bf16.msra.mxu0 %v1770_v6  ;;  %s1920_s29 = scalar_lea.vmem %s2063_s0, %s1498_s17  ;;  %s1928_s9 = scalar_lea.vmem %s2066_s3, %s1436_s25  ;;  %1661 = vmatpush3.bf16.msra.mxu1 %v1782_v25 }
  0x11   : > { %1568 = vmatprep.subr.bf16.mxu0 %v1771_v7  ;;  %v374_v12 = vld [vmem:[%s1920_s29 + $0x8] sm:$0xff]  ;;  %v689_v14 = vld [vmem:[%s1928_s9] sm:$0xff]  ;;  %v691_v16 = vld [vmem:[%s1928_s9 + $0x10] sm:$0xff]  ;;  %s1434_s7 = sshll.u32 %s2077_s12, 2  ;;  %1662 = vmatprep.subr.bf16.mxu1 %v1783_v28 }
  0x12   : > { %v382_v13 = vunpack.c.l.s8.bf16 %v374_v12  ;;  %707 = vperm.xlu0 %1763, %v689_v14   ;;  %717 = vperm.xlu1 %1764, %v691_v16   ;;  %v690_v18 = vld [vmem:[%s1928_s9 + $0x8] sm:$0xff]  ;;  %v692_v19 = vld [vmem:[%s1928_s9 + $0x18] sm:$0xff]  ;;  %v693_v22 = vld [vmem:[%s1928_s9 + $0x20] sm:$0xff]  ;;  %s1972_s14 = scalar_lea.vmem %s2065_s2, %s1434_s7  ;;  %v384_v32 = vunpack.c.h.s8.bf16 %v374_v12  ;;  %s2044_s27 = scalar_lea.vmem %s2069_s6, %s1434_s7 }
  0x13   : > { %v694_v26 = vld [vmem:[%s1928_s9 + $0x28] sm:$0xff]  ;;  %v373_v27 = vld [vmem:[%s1920_s29] sm:$0xff]  ;;  %v695_v29 = vld [vmem:[%s1928_s9 + $0x30] sm:$0xff] }
  0x14   : > { %1569 = vmatpush3.bf16.msra.mxu0 %v1772_v8  ;;  %573 = vmatprep.mubr.bf16.mxu0 %v382_v13  ;;  %v381_v30 = vunpack.c.l.s8.bf16 %v373_v27  ;;  %v696_v31 = vld [vmem:[%s1928_s9 + $0x38] sm:$0xff]  ;;  %v1789_v34 = vld [vmem:[%s1972_s14] sm:$0xff]   ;;  %v698_v36 = vld [vmem:[%s1928_s9 + $0x48] sm:$0xff]  ;;  %v383_v40 = vunpack.c.h.s8.bf16 %v373_v27 }
  0x15   : > { %1570 = vmatprep.subr.bf16.mxu0 %v1773_v9  ;;  %v697_v35 = vld [vmem:[%s1928_s9 + $0x40] sm:$0xff]  ;;  %1674 = vmatprep.mubr.bf16.mxu1 %v1789_v34  ;;  %v376_v37 = vld [vmem:[%s1920_s29 + $0x18] sm:$0xff]  ;;  %v699_v39 = vld [vmem:[%s1928_s9 + $0x50] sm:$0xff] }
  0x16   : > { %712 = vperm.xlu0 %1763, %v690_v18   ;;  %722 = vperm.xlu1 %1764, %v692_v19   ;;  %v700_v41 = vld [vmem:[%s1928_s9 + $0x58] sm:$0xff]  ;;  %v386_v42 = vunpack.c.l.s8.bf16 %v376_v37  ;;  %v701_v43 = vld [vmem:[%s1928_s9 + $0x60] sm:$0xff]  ;;  %v702_v45 = vld [vmem:[%s1928_s9 + $0x68] sm:$0xff]  ;;  %v388_v51 = vunpack.c.h.s8.bf16 %v376_v37 }
  0x17   : > { %1663 = vmatpush3.bf16.msra.mxu1 %v1783_v28  ;;  %v375_v46 = vld [vmem:[%s1920_s29 + $0x10] sm:$0xff]  ;;  %v704_v50 = vld [vmem:[%s1928_s9 + $0x78] sm:$0xff]  ;;  %v378_v53 = vld [vmem:[%s1920_s29 + $0x28] sm:$0xff] }
  0x18   : > { %1571 = vmatpush3.bf16.msra.mxu0 %v1774_v10  ;;  %1664 = vmatprep.subr.bf16.mxu1 %v1784_v33  ;;  %v703_v48 = vld [vmem:[%s1928_s9 + $0x70] sm:$0xff]  ;;  %v385_v49 = vunpack.c.l.s8.bf16 %v375_v46  ;;  %v387_v55 = vunpack.c.h.s8.bf16 %v375_v46  ;;  %v1790_v56 = vld [vmem:[%s1972_s14 + $0x8] sm:$0xff]   ;;  %v390_v57 = vunpack.c.l.s8.bf16 %v378_v53  ;;  %v377_v60 = vld [vmem:[%s1920_s29 + $0x20] sm:$0xff]  ;;  %v392_v0 = vunpack.c.h.s8.bf16 %v378_v53 }
  0x19   : > { %1572 = vmatprep.subr.bf16.mxu0 %v1775_v11  ;;  %v1793_v59 = vld [vmem:[%s1972_s14 + $0x10] sm:$0xff]   ;;  %v389_v62 = vunpack.c.l.s8.bf16 %v377_v60  ;;  %v1794_v63 = vld [vmem:[%s1972_s14 + $0x18] sm:$0xff]   ;;  %v391_v3 = vunpack.c.h.s8.bf16 %v377_v60  ;;  %v1797_v9 = vld [vmem:[%s1972_s14 + $0x20] sm:$0xff]  }
  0x1a   : > { %727 = vperm.xlu0 %1763, %v693_v22   ;;  %732 = vperm.xlu1 %1764, %v694_v26   ;;  %v380_v2 = vld [vmem:[%s1920_s29 + $0x38] sm:$0xff]  ;;  %v379_v5 = vld [vmem:[%s1920_s29 + $0x30] sm:$0xff]  ;;  %v1798_v10 = vld [vmem:[%s1972_s14 + $0x28] sm:$0xff]  }
  0x1b   : > { %1665 = vmatpush3.bf16.msra.mxu1 %v1784_v33  ;;  %v394_v4 = vunpack.c.l.s8.bf16 %v380_v2  ;;  %v393_v6 = vunpack.c.l.s8.bf16 %v379_v5  ;;  %v396_v7 = vunpack.c.h.s8.bf16 %v380_v2  ;;  %v395_v8 = vunpack.c.h.s8.bf16 %v379_v5  ;;  %v1799_v11 = vld [vmem:[%s2067_s4 + $0x20] sm:$0xff]   ;;  %v1800_v12 = vld [vmem:[%s2067_s4 + $0x28] sm:$0xff]   ;;  %v1801_v13 = vld [vmem:[%s1972_s14 + $0x30] sm:$0xff]  }
  0x1c   : > { %1573 = vmatpush3.bf16.msra.mxu0 %v1776_v15  ;;  %1666 = vmatprep.subr.bf16.mxu1 %v1785_v38  ;;  %v1802_v14 = vld [vmem:[%s1972_s14 + $0x38] sm:$0xff]   ;;  %v1803_v15 = vld [vmem:[%s2067_s4 + $0x30] sm:$0xff]  }
  0x1d   : > { %1574 = vmatprep.subr.bf16.mxu0 %v1777_v17  ;;  %v1804_v16 = vld [vmem:[%s2067_s4 + $0x38] sm:$0xff]  }
  0x1e   : > { %737 = vperm.xlu0 %1763, %v695_v29   ;;  %742 = vperm.xlu1 %1764, %v696_v31  }
  0x1f   : > { %1667 = vmatpush3.bf16.msra.mxu1 %v1785_v38 }
  0x20   : > { %1575 = vmatpush3.bf16.msra.mxu0 %v1778_v20  ;;  %1668 = vmatprep.subr.bf16.mxu1 %v1786_v44 }
  0x21   : > { %1576 = vmatprep.subr.bf16.mxu0 %v1779_v21 }
  0x22   : > { %747 = vperm.xlu0 %1763, %v697_v35   ;;  %752 = vperm.xlu1 %1764, %v698_v36  }
  0x23   : > { %1669 = vmatpush3.bf16.msra.mxu1 %v1786_v44 }
  0x24   : > { %1577 = vmatpush3.bf16.msra.mxu0 %v1780_v24  ;;  %1670 = vmatprep.subr.bf16.mxu1 %v1787_v47 }
  0x26   : > { %757 = vperm.xlu0 %1763, %v699_v39   ;;  %762 = vperm.xlu1 %1764, %v700_v41  }
  0x27   : > { %574 = vmatmul.mubr.bf16.vlgmr.msra.gmra.mrb[0].mxu0 %v381_v30  ;;  %1671 = vmatpush3.bf16.msra.mxu1 %v1787_v47 }
  0x28   : > { %581 = vmatprep.mubr.bf16.mxu0 %v384_v32  ;;  %1672 = vmatprep.subr.bf16.mxu1 %v1788_v52 }
  0x2a   : > { %767 = vperm.xlu0 %1763, %v701_v43   ;;  %772 = vperm.xlu1 %1764, %v702_v45  }
  0x2b   : > { %1673 = vmatpush3.bf16.msra.mxu1 %v1788_v52 }
  0x2c   : > { %1690 = vmatprep.subr.bf16.mxu1 %v1791_v54 }
  0x2e   : > { %777 = vperm.xlu0 %1763, %v703_v48   ;;  %782 = vperm.xlu1 %1764, %v704_v50  }
  0x2f   : > { %582 = vmatmul.mubr.bf16.gmra.mrb[4].mxu0 %v383_v40  ;;  %1675 = vmatmul.mubr.bf16.vlgmr.msra.gmra.mrb[0].mxu1 %v1790_v56 }
  0x30   : > { %589 = vmatprep.mubr.bf16.mxu0 %v386_v42  ;;  %1691 = vmatpush3.bf16.msra.mxu1 %v1791_v54 }
  0x31   : > { %1692 = vmatprep.subr.bf16.mxu1 %v1792_v58  ;;  %1678 = vmatprep.mubr.bf16.mxu1 %v1793_v59 }
  0x34   : > { %1693 = vmatpush3.bf16.msra.mxu1 %v1792_v58 }
  0x35   : > { %1694 = vmatprep.subr.bf16.mxu1 %v1795_v61 }
  0x37   : > { %590 = vmatmul.mubr.bf16.gmra.mrb[8].mxu0 %v385_v49  ;;  %1679 = vmatmul.mubr.bf16.gmra.mrb[4].mxu1 %v1794_v63 }
  0x38   : > { %597 = vmatprep.mubr.bf16.mxu0 %v388_v51  ;;  %1695 = vmatpush3.bf16.msra.mxu1 %v1795_v61 }
  0x39   : > { %1696 = vmatprep.subr.bf16.mxu1 %v1796_v1  ;;  %1682 = vmatprep.mubr.bf16.mxu1 %v1797_v9 }
  0x3c   : > { %1697 = vmatpush3.bf16.msra.mxu1 %v1796_v1 }
  0x3d   : > { %1698 = vmatprep.subr.bf16.mxu1 %v1799_v11 }
  0x3f   : > { %598 = vmatmul.mubr.bf16.gmra.mrb[12].mxu0 %v387_v55  ;;  %1683 = vmatmul.mubr.bf16.gmra.mrb[8].mxu1 %v1798_v10 }
  0x40   : > { %605 = vmatprep.mubr.bf16.mxu0 %v390_v57  ;;  %1699 = vmatpush3.bf16.msra.mxu1 %v1799_v11 }
  0x41   : > { %1700 = vmatprep.subr.bf16.mxu1 %v1800_v12  ;;  %1686 = vmatprep.mubr.bf16.mxu1 %v1801_v13 }
  0x44   : > { %1701 = vmatpush3.bf16.msra.mxu1 %v1800_v12 }
  0x45   : > { %1702 = vmatprep.subr.bf16.mxu1 %v1803_v15 }
  0x47   : > { %606 = vmatmul.mubr.bf16.gmra.mrb[16].mxu0 %v389_v62  ;;  %1687 = vmatmul.mubr.bf16.gmra.mrb[12].mxu1 %v1802_v14 }
  0x48   : > { %613 = vmatprep.mubr.bf16.mxu0 %v392_v0  ;;  %1703 = vmatpush3.bf16.msra.mxu1 %v1803_v15 }
  0x49   : > { %1704 = vmatprep.subr.bf16.mxu1 %v1804_v16 }
  0x4c   : > { %1705 = vmatpush3.bf16.msra.mxu1 %v1804_v16 }
  0x4f   : > { %614 = vmatmul.mubr.bf16.gmra.mrb[20].mxu0 %v391_v3 }
  0x50   : > { %621 = vmatprep.mubr.bf16.mxu0 %v394_v4 }
  0x57   : > { %622 = vmatmul.mubr.bf16.gmra.mrb[24].mxu0 %v393_v6 }
  0x58   : > { %629 = vmatprep.mubr.bf16.mxu0 %v396_v7 }
  0x5f   : > { %630 = vmatmul.mubr.bf16.gmra.mrb[28].mxu0 %v395_v8 }
  0x91   : > { %v708_v17 = vpop.permute.xlu0 %707  ;;  %v718_v27 = vpop.permute.xlu1 %717 }
  0x95   : > { %v713_v23 = vpop.permute.xlu0 %712  ;;  %v723_v35 = vpop.permute.xlu1 %722 }
  0x99   : > { %v728_v45 = vpop.permute.xlu0 %727  ;;  %v733_v46 = vpop.permute.xlu1 %732 }
  0x9d   : > { %v738_v56 = vpop.permute.xlu0 %737  ;;  %v743_v57 = vpop.permute.xlu1 %742 }
  0xa1   : > { %v748_v3 = vpop.permute.xlu0 %747  ;;  %v753_v4 = vpop.permute.xlu1 %752 }
  0xa5   : > { %v758_v14 = vpop.permute.xlu0 %757  ;;  %v763_v15 = vpop.permute.xlu1 %762 }
  0xfa   : > { %v1578_v18 = vpop.f32.mrb[0].mxu0 }
  0xfb   : > { %v1579_v19 = vpop.f32.mrb[1].mxu0 }
  0xfc   : > { %v1580_v20 = vadd.f32 %v1579_v19, %v1578_v18  ;;  %v1581_v21 = vpop.f32.mrb[2].mxu0 }
  0xfd   : > { %v1582_v22 = vpop.f32.mrb[3].mxu0 }
  0xfe   : > { %v1583_v24 = vadd.f32 %v1582_v22, %v1581_v21  ;;  %v785_v25 = vmul.f32 %v1580_v20, %v708_v17 }
 0x100   : > { %v786_v26 = vmul.f32 %v1583_v24, %v713_v23 }
 0x102   : > { %v801_v28 = vpack.c.bf16 %v786_v26, %v785_v25  ;;  %v1584_v29 = vpop.f32.mrb[4].mxu0  ;;  %v768_v25 = vpop.permute.xlu0 %767 }
 0x103   : > { %v1585_v30 = vpop.f32.mrb[5].mxu0  ;;  %v773_v26 = vpop.permute.xlu1 %772 }
 0x104   : > { %v1586_v31 = vadd.f32 %v1585_v30, %v1584_v29  ;;  %v1587_v32 = vpop.f32.mrb[6].mxu0  ;;  %1706 = vmatprep.mubr.bf16.mxu1 %v801_v28 }
 0x105   : > { %v1588_v33 = vpop.f32.mrb[7].mxu0 }
 0x106   : > { %v1589_v34 = vadd.f32 %v1588_v33, %v1587_v32  ;;  %v787_v36 = vmul.f32 %v1586_v31, %v718_v27 }
 0x108   : > { %v788_v37 = vmul.f32 %v1589_v34, %v723_v35 }
 0x10a   : > { %v802_v38 = vpack.c.bf16 %v788_v37, %v787_v36  ;;  %v1590_v39 = vpop.f32.mrb[8].mxu0  ;;  %v778_v36 = vpop.permute.xlu0 %777 }
 0x10b   : > { %v1591_v40 = vpop.f32.mrb[9].mxu0  ;;  %v783_v37 = vpop.permute.xlu1 %782 }
 0x10c   : > { %v1592_v41 = vadd.f32 %v1591_v40, %v1590_v39  ;;  %v1593_v42 = vpop.f32.mrb[10].mxu0  ;;  %1707 = vmatmul.mubr.bf16.vlgmr.msra.gmra.mrb[0].mxu1 %v802_v38 }
 0x10d   : > { %v1594_v43 = vpop.f32.mrb[11].mxu0 }
 0x10e   : > { %v1595_v44 = vadd.f32 %v1594_v43, %v1593_v42  ;;  %v789_v47 = vmul.f32 %v1592_v41, %v728_v45  ;;  %v1479_v41 = vld [vmem:[%s2068_s5] ss:$0 sm:$0xff] }
 0x110   : > { %v790_v48 = vmul.f32 %v1595_v44, %v733_v46 }
 0x112   : > { %v1596_v49 = vpop.f32.mrb[12].mxu0  ;;  %v803_v50 = vpack.c.bf16 %v790_v48, %v789_v47 }
 0x113   : > { %v1597_v51 = vpop.f32.mrb[13].mxu0 }
 0x114   : > { %v1598_v52 = vadd.f32 %v1597_v51, %v1596_v49  ;;  %v1599_v53 = vpop.f32.mrb[14].mxu0  ;;  %1710 = vmatprep.mubr.bf16.mxu1 %v803_v50 }
 0x115   : > { %v1600_v54 = vpop.f32.mrb[15].mxu0 }
 0x116   : > { %v1601_v55 = vadd.f32 %v1600_v54, %v1599_v53  ;;  %v791_v58 = vmul.f32 %v1598_v52, %v738_v56 }
 0x118   : > { %v792_v59 = vmul.f32 %v1601_v55, %v743_v57 }
 0x11a   : > { %v1602_v60 = vpop.f32.mrb[16].mxu0  ;;  %v804_v61 = vpack.c.bf16 %v792_v59, %v791_v58 }
 0x11b   : > { %v1603_v62 = vpop.f32.mrb[17].mxu0 }
 0x11c   : > { %v1604_v63 = vadd.f32 %v1603_v62, %v1602_v60  ;;  %v1605_v0 = vpop.f32.mrb[18].mxu0  ;;  %1711 = vmatmul.mubr.bf16.gmra.mrb[4].mxu1 %v804_v61 }
 0x11d   : > { %v1606_v1 = vpop.f32.mrb[19].mxu0 }
 0x11e   : > { %v1607_v2 = vadd.f32 %v1606_v1, %v1605_v0  ;;  %v793_v5 = vmul.f32 %v1604_v63, %v748_v3 }
 0x120   : > { %v794_v6 = vmul.f32 %v1607_v2, %v753_v4 }
 0x122   : > { %v1608_v7 = vpop.f32.mrb[20].mxu0  ;;  %v805_v8 = vpack.c.bf16 %v794_v6, %v793_v5 }
 0x123   : > { %v1609_v9 = vpop.f32.mrb[21].mxu0 }
 0x124   : > { %v1610_v10 = vadd.f32 %v1609_v9, %v1608_v7  ;;  %v1611_v11 = vpop.f32.mrb[22].mxu0  ;;  %1714 = vmatprep.mubr.bf16.mxu1 %v805_v8 }
 0x125   : > { %v1612_v12 = vpop.f32.mrb[23].mxu0 }
 0x126   : > { %v1613_v13 = vadd.f32 %v1612_v12, %v1611_v11  ;;  %v795_v16 = vmul.f32 %v1610_v10, %v758_v14 }
 0x128   : > { %v796_v17 = vmul.f32 %v1613_v13, %v763_v15 }
 0x12a   : > { %v1614_v18 = vpop.f32.mrb[24].mxu0  ;;  %v806_v19 = vpack.c.bf16 %v796_v17, %v795_v16 }
 0x12b   : > { %v1615_v20 = vpop.f32.mrb[25].mxu0 }
 0x12c   : > { %v1616_v21 = vadd.f32 %v1615_v20, %v1614_v18  ;;  %v1617_v22 = vpop.f32.mrb[26].mxu0  ;;  %1715 = vmatmul.mubr.bf16.gmra.mrb[8].mxu1 %v806_v19 }
 0x12d   : > { %v1618_v23 = vpop.f32.mrb[27].mxu0 }
 0x12e   : > { %v1619_v24 = vadd.f32 %v1618_v23, %v1617_v22  ;;  %v797_v27 = vmul.f32 %v1616_v21, %v768_v25 }
 0x130   : > { %v798_v28 = vmul.f32 %v1619_v24, %v773_v26 }
 0x132   : > { %v1620_v29 = vpop.f32.mrb[28].mxu0  ;;  %v807_v30 = vpack.c.bf16 %v798_v28, %v797_v27 }
 0x133   : > { %v1621_v31 = vpop.f32.mrb[29].mxu0 }
 0x134   : > { %v1622_v32 = vadd.f32 %v1621_v31, %v1620_v29  ;;  %v1623_v33 = vpop.f32.mrb[30].mxu0  ;;  %1718 = vmatprep.mubr.bf16.mxu1 %v807_v30 }
 0x135   : > { %v1624_v34 = vpop.f32.mrb[31].mxu0 }
 0x136   : > { %v1625_v35 = vadd.f32 %v1624_v34, %v1623_v33  ;;  %v799_v38 = vmul.f32 %v1622_v32, %v778_v36 }
 0x138   : > { %v800_v39 = vmul.f32 %v1625_v35, %v783_v37 }
 0x13a   : > { %v808_v40 = vpack.c.bf16 %v800_v39, %v799_v38 }
 0x13c   : > { %1719 = vmatmul.mubr.bf16.gmra.mrb[12].mxu1 %v808_v40 }
 0x1df   : > { %v1708_v42 = vpop.f32.mrb[0].mxu1 }
 0x1e0   : > { %v1204_v43 = vadd.f32 %v1708_v42, %v1479_v41  ;;  %v1132_v44 = vpop.f32.mrb[1].mxu1 }
 0x1e1   : > { %v1202_v45 = vadd.f32 %v1479_v41, %v1132_v44  ;;  %v1709_v46 = vpop.f32.mrb[2].mxu1 }
 0x1e2   : > { %v1205_v47 = vadd.f32 %v1709_v46, %v1479_v41  ;;  %v1135_v48 = vpop.f32.mrb[3].mxu1  ;;  %v1220_v50 = vmax.f32 %v1204_v43, 0.0 }
 0x1e3   : > { %v1203_v49 = vadd.f32 %v1479_v41, %v1135_v48  ;;  %v1218_v52 = vmax.f32 %v1202_v45, 0.0 }
 0x1e4   : > { %v1221_v51 = vmax.f32 %v1205_v47, 0.0 }
 0x1e5   : > { %v1219_v53 = vmax.f32 %v1203_v49, 0.0 }
 0x1e6   : > { %v1523_v54 = vpack.c.bf16 %v1221_v51, %v1220_v50 }
 0x1e7   : > { %v1518_v55 = vpack.c.bf16 %v1219_v53, %v1218_v52 }
 0x1e8   : > { %1555 = vst [vmem:[%s2044_s27 + $0x8] sm:$0xff] %v1523_v54  }
 0x1e9   : > { %1519 = vst [vmem:[%s2044_s27] sm:$0xff] %v1518_v55  }
 0x1ef   : > { %v1712_v56 = vpop.f32.mrb[4].mxu1 }
 0x1f0   : > { %v1208_v57 = vadd.f32 %v1712_v56, %v1479_v41  ;;  %v1148_v58 = vpop.f32.mrb[5].mxu1 }
 0x1f1   : > { %v1206_v59 = vadd.f32 %v1479_v41, %v1148_v58  ;;  %v1713_v60 = vpop.f32.mrb[6].mxu1 }
 0x1f2   : > { %v1209_v61 = vadd.f32 %v1713_v60, %v1479_v41  ;;  %v1151_v62 = vpop.f32.mrb[7].mxu1  ;;  %v1224_v0 = vmax.f32 %v1208_v57, 0.0 }
 0x1f3   : > { %v1207_v63 = vadd.f32 %v1479_v41, %v1151_v62  ;;  %v1222_v2 = vmax.f32 %v1206_v59, 0.0 }
 0x1f4   : > { %v1225_v1 = vmax.f32 %v1209_v61, 0.0 }
 0x1f5   : > { %v1223_v3 = vmax.f32 %v1207_v63, 0.0 }
 0x1f6   : > { %v1533_v4 = vpack.c.bf16 %v1225_v1, %v1224_v0 }
 0x1f7   : > { %v1528_v5 = vpack.c.bf16 %v1223_v3, %v1222_v2 }
 0x1f8   : > { %1557 = vst [vmem:[%s2044_s27 + $0x18] sm:$0xff] %v1533_v4  }
 0x1f9   : > { %1556 = vst [vmem:[%s2044_s27 + $0x10] sm:$0xff] %v1528_v5  }
 0x1ff   : > { %v1716_v6 = vpop.f32.mrb[8].mxu1 }
 0x200   : > { %v1212_v7 = vadd.f32 %v1716_v6, %v1479_v41  ;;  %v1164_v8 = vpop.f32.mrb[9].mxu1 }
 0x201   : > { %v1210_v9 = vadd.f32 %v1479_v41, %v1164_v8  ;;  %v1717_v10 = vpop.f32.mrb[10].mxu1 }
 0x202   : > { %v1213_v11 = vadd.f32 %v1717_v10, %v1479_v41  ;;  %v1167_v12 = vpop.f32.mrb[11].mxu1  ;;  %v1228_v14 = vmax.f32 %v1212_v7, 0.0 }
 0x203   : > { %v1211_v13 = vadd.f32 %v1479_v41, %v1167_v12  ;;  %v1226_v16 = vmax.f32 %v1210_v9, 0.0 }
 0x204   : > { %v1229_v15 = vmax.f32 %v1213_v11, 0.0 }
 0x205   : > { %v1227_v17 = vmax.f32 %v1211_v13, 0.0 }
 0x206   : > { %v1543_v18 = vpack.c.bf16 %v1229_v15, %v1228_v14 }
 0x207   : > { %v1538_v19 = vpack.c.bf16 %v1227_v17, %v1226_v16 }
 0x208   : > { %1559 = vst [vmem:[%s2044_s27 + $0x28] sm:$0xff] %v1543_v18  }
 0x209   : > { %1558 = vst [vmem:[%s2044_s27 + $0x20] sm:$0xff] %v1538_v19  }
 0x20f   : > { %v1720_v20 = vpop.f32.mrb[12].mxu1 }
 0x210   : > { %v1216_v21 = vadd.f32 %v1720_v20, %v1479_v41  ;;  %v1180_v22 = vpop.f32.mrb[13].mxu1 }
 0x211   : > { %v1214_v23 = vadd.f32 %v1479_v41, %v1180_v22  ;;  %v1721_v24 = vpop.f32.mrb[14].mxu1 }
 0x212   : > { %v1217_v25 = vadd.f32 %v1721_v24, %v1479_v41  ;;  %v1183_v26 = vpop.f32.mrb[15].mxu1  ;;  %v1232_v28 = vmax.f32 %v1216_v21, 0.0 }
 0x213   : > { %v1215_v27 = vadd.f32 %v1479_v41, %v1183_v26  ;;  %v1230_v30 = vmax.f32 %v1214_v23, 0.0 }
 0x214   : > { %v1233_v29 = vmax.f32 %v1217_v25, 0.0 }
 0x215   : > { %v1231_v31 = vmax.f32 %v1215_v27, 0.0 }
 0x216   : > { %v1553_v32 = vpack.c.bf16 %v1233_v29, %v1232_v28 }
 0x217   : > { %v1548_v33 = vpack.c.bf16 %v1231_v31, %v1230_v30 }
 0x218   : > { %1561 = vst [vmem:[%s2044_s27 + $0x38] sm:$0xff] %v1553_v32  }
 0x219   : > { %1560 = vst [vmem:[%s2044_s27 + $0x30] sm:$0xff] %v1548_v33  }
 0x21a PF: > { %s16_s23 = sadd.s32 1, %s1827_s23   ;;  %s2070_s21 = smov %s1823_s22 }
 0x21b   : > { %p13_p6 = scmp.ge.s32.totalorder %s16_s23, 4   ;;  %s2071_s22 = smov %s2073_s24 }
 0x21d   :  { %15 = sbr.rel (!%p13_p6) target bundleno = 2 (0x2), region = 91 }

</bundles_post_ra>
